<compile_context>
chip_gen: v7x
topology: tpu7x:2x2x1
jax: 0.10.0
libtpu: 0.0.40
codegen_flags: <defaults>
</compile_context>

<pallas_src>
import functools

import jax
import jax.numpy as jnp
from jax.experimental import pallas as pl
from jax.experimental.pallas import tpu as pltpu

_LANE = 128
_SUBLANE = 8
_DEFAULT_ROW_TILE = 4096            # (4096, 128) f32 = 2 MiB per input block
_VMEM_LIMIT_BYTES = 32 * 1024 * 1024


def _focal_elementwise(p, t, alpha, gamma, binary_targets):
    """Per-element focal loss (PyTorch F.binary_cross_entropy semantics)."""
    p = p.astype(jnp.float32)
    t = t.astype(jnp.float32)          # targets may arrive as bf16 / u8
    if binary_targets:
        # Fast path (targets in {0,1}): a single log per element; the select
        # and square run on the 4-wide VALU.  Identical to the reference up to
        # the -100 log clamp, which only matters for p < e^-100 (~4e-44).
        pt = jnp.where(t > 0.5, p, 1.0 - p)
        bce = jnp.minimum(-jnp.log(pt), 100.0)
    else:
        # Reference semantics (supports soft labels).  F.binary_cross_entropy
        # clamps each log term at -100.
        log_p = jnp.maximum(jnp.log(p), -100.0)
        log_1mp = jnp.maximum(jnp.log(1.0 - p), -100.0)
        bce = -(t * log_p + (1.0 - t) * log_1mp)
        pt = jnp.exp(-bce)
    om = 1.0 - pt
    g = float(gamma)
    if g == 2.0:
        mod = om * om                  # VALU square instead of EUP pow
    elif g == float(int(g)) and int(g) >= 0:
        mod = jnp.ones_like(om)
        for _ in range(int(g)):
            mod = mod * om
    else:
        mod = jnp.maximum(om, 0.0) ** jnp.float32(g)
    return jnp.float32(alpha) * mod * bce


def _focal_partial_sum_kernel(x_ref, t_ref, out_ref, *, alpha, gamma,
                              binary_targets, rt, rows_in_last_tile):
    f = _focal_elementwise(x_ref[...], t_ref[...], alpha, gamma, binary_targets)
    if rows_in_last_tile != rt:
        # Last input block is partial: rows >= rows_in_last_tile hold stale
        # VMEM data.  Zero them before summing (iota + cmp + select on VPU).
        valid = jnp.where(pl.program_id(0) == pl.num_programs(0) - 1,
                          rows_in_last_tile, rt)
        row_idx = jax.lax.broadcasted_iota(jnp.int32, f.shape, 0)
        f = jnp.where(row_idx < valid, f, 0.0)
    # Sublane-aligned partial sum: pure vreg adds, no per-step XLU reduce and
    # no serial RMW chain across the grid.
    partial = jnp.sum(f.reshape(rt // _SUBLANE, _SUBLANE, _LANE), axis=0)
    out_ref[...] = partial.reshape(1, _SUBLANE, _LANE)


def _focal_none_kernel(x_ref, t_ref, out_ref, *, alpha, gamma, binary_targets):
    # Out-of-bounds rows of a partial last block are dropped on the output
    # writeback, so no tail masking is needed here.
    out_ref[...] = _focal_elementwise(x_ref[...], t_ref[...], alpha, gamma,
                                      binary_targets)


def _prepare(inputs, targets, row_tile):
    n = inputs.size
    x_flat = inputs.reshape(-1)
    t_flat = targets.reshape(-1)
    rem = n % _LANE
    if rem:
        # Ragged tail: pad only to the next lane multiple with neutral values
        # (p=1, t=1 -> loss exactly 0).  The lane-aligned common case below is
        # a zero-copy reshape with in-kernel tail-row masking instead.
        pad = _LANE - rem
        x_flat = jnp.pad(x_flat, (0, pad), constant_values=1)
        t_flat = jnp.pad(t_flat, (0, pad), constant_values=1)
    rows = x_flat.size // _LANE
    x2d = x_flat.reshape(rows, _LANE)   # free reshape (contiguous, row-major)
    t2d = t_flat.reshape(rows, _LANE)
    rt = max(_SUBLANE, min(int(row_tile), rows))
    rt = -(-rt // _SUBLANE) * _SUBLANE            # multiple of 8 sublanes
    num_tiles = -(-rows // rt)
    rows_in_last_tile = rows - (num_tiles - 1) * rt
    return x2d, t2d, rt, num_tiles, rows, rows_in_last_tile, n


def focal_loss(inputs, targets, *, alpha=0.25, gamma=2.0, reduction="mean",
               binary_targets=True, row_tile=_DEFAULT_ROW_TILE):
    """Focal loss matching the PyTorch FocalLoss module.

    binary_targets=True enables a 1-transcendental/element fast path that is
    exact for targets in {0, 1}; pass False for soft labels.  Targets may be
    any dtype (f32 / bf16 / u8); they are cast inside the kernel.
    """
    assert inputs.shape == targets.shape
    orig_shape = inputs.shape
    x2d, t2d, rt, num_tiles, rows, rows_last, n = _prepare(
        inputs, targets, row_tile)

    compiler_params = pltpu.CompilerParams(
        # Independent tiles, no carried accumulator -> truly parallel axis.
        # TODO(synk): on v7x confirm in the trace that the grid shards across
        # both TensorCores; if not, switch this axis to pltpu.CORE_PARALLEL.
        dimension_semantics=("parallel",),
        vmem_limit_bytes=_VMEM_LIMIT_BYTES,
    )

    if reduction in ("mean", "sum"):
        kernel = functools.partial(
            _focal_partial_sum_kernel, alpha=float(alpha), gamma=float(gamma),
            binary_targets=bool(binary_targets), rt=rt,
            rows_in_last_tile=rows_last)
        partials = pl.pallas_call(
            kernel,
            out_shape=jax.ShapeDtypeStruct((num_tiles, _SUBLANE, _LANE),
                                           jnp.float32),
            grid_spec=pltpu.PrefetchScalarGridSpec(
                num_scalar_prefetch=0,
                grid=(num_tiles,),
                in_specs=[
                    pl.BlockSpec((rt, _LANE), lambda i: (i, 0)),
                    pl.BlockSpec((rt, _LANE), lambda i: (i, 0)),
                ],
                out_specs=pl.BlockSpec((1, _SUBLANE, _LANE),
                                       lambda i: (i, 0, 0)),
            ),
            compiler_params=compiler_params,
        )(x2d, t2d)
        loss_sum = jnp.sum(partials)
        if reduction == "mean":
            return loss_sum / jnp.float32(n)
        return loss_sum

    elif reduction == "none":
        kernel = functools.partial(
            _focal_none_kernel, alpha=float(alpha), gamma=float(gamma),
            binary_targets=bool(binary_targets))
        out = pl.pallas_call(
            kernel,
            out_shape=jax.ShapeDtypeStruct((rows, _LANE), jnp.float32),
            grid_spec=pltpu.PrefetchScalarGridSpec(
                num_scalar_prefetch=0,
                grid=(num_tiles,),
                in_specs=[
                    pl.BlockSpec((rt, _LANE), lambda i: (i, 0)),
                    pl.BlockSpec((rt, _LANE), lambda i: (i, 0)),
                ],
                out_specs=pl.BlockSpec((rt, _LANE), lambda i: (i, 0)),
            ),
            compiler_params=compiler_params,
        )(x2d, t2d)
        if rows * _LANE == n:
            return out.reshape(orig_shape)                 # free reshape
        return out.reshape(-1)[:n].reshape(orig_shape)     # ragged fallback

    else:
        raise ValueError(f"unknown reduction: {reduction}")


def _focal_loss_ref(inputs, targets, alpha=0.25, gamma=2.0, reduction="mean"):
    p = inputs.astype(jnp.float32)
    t = targets.astype(jnp.float32)
    log_p = jnp.maximum(jnp.log(p), -100.0)
    log_1mp = jnp.maximum(jnp.log(1.0 - p), -100.0)
    bce = -(t * log_p + (1.0 - t) * log_1mp)
    pt = jnp.exp(-bce)
    f = alpha * (1.0 - pt) ** gamma * bce
    if reduction == "mean":
        return jnp.mean(f)
    if reduction == "sum":
        return jnp.sum(f)
    return f


if __name__ == "__main__":
    key = jax.random.PRNGKey(0)
    k1, k2, k3, k4, k5 = jax.random.split(key, 5)

    # --- case 1: NCHW, lane-aligned (no pad), bf16 binary targets, 'mean' ---
    B, C, H, W = 2, 4, 16, 16
    inputs = jax.nn.sigmoid(jax.random.normal(k1, (B, C, H, W), jnp.float32))
    targets_f32 = (jax.random.uniform(k2, (B, C, H, W)) > 0.5).astype(jnp.float32)
    targets_bf16 = targets_f32.astype(jnp.bfloat16)   # narrow-dtype HBM path

    loss = jax.block_until_ready(
        focal_loss(inputs, targets_bf16, alpha=0.25, gamma=2.0,
                   reduction="mean", binary_targets=True))
    ref = _focal_loss_ref(inputs, targets_f32, reduction="mean")
    assert jnp.allclose(loss, ref, rtol=1e-5, atol=1e-6), (loss, ref)

    # --- case 2: non-lane-aligned size (ragged tail + tile mask), 'sum' ---
    inputs2 = jax.nn.sigmoid(jax.random.normal(k3, (2, 3, 15, 17), jnp.float32))
    targets2 = (jax.random.uniform(k4, (2, 3, 15, 17)) > 0.5).astype(jnp.float32)
    loss2 = jax.block_until_ready(
        focal_loss(inputs2, targets2, alpha=0.25, gamma=2.0,
                   reduction="sum", binary_targets=True))
    ref2 = _focal_loss_ref(inputs2, targets2, reduction="sum")
    assert jnp.allclose(loss2, ref2, rtol=1e-5, atol=1e-5), (loss2, ref2)

    # --- case 3: reduction='none' elementwise output (no slice/copy) ---
    out3 = jax.block_until_ready(
        focal_loss(inputs, targets_bf16, alpha=0.25, gamma=2.0,
                   reduction="none", binary_targets=True))
    ref3 = _focal_loss_ref(inputs, targets_f32, reduction="none")
    assert out3.shape == ref3.shape
    assert jnp.allclose(out3, ref3, rtol=1e-5, atol=1e-6)

    # --- case 4: soft labels -> reference (3-transcendental) path ---
    targets_soft = jax.random.uniform(k5, (B, C, H, W), dtype=jnp.float32)
    loss4 = jax.block_until_ready(
        focal_loss(inputs, targets_soft, alpha=0.25, gamma=2.0,
                   reduction="mean", binary_targets=False))
    ref4 = _focal_loss_ref(inputs, targets_soft, reduction="mean")
    assert jnp.allclose(loss4, ref4, rtol=1e-5, atol=1e-6), (loss4, ref4)

    print("KERNEL_OK")
</pallas_src>

<mosaic_0001>
module attributes {stable_mosaic.version = 11 : i64} {
  func.func @_focal_partial_sum_kernel(%arg0: i32, %arg1: memref<16x128xf32, #tpu.memory_space<vmem>>, %arg2: memref<16x128xbf16, #tpu.memory_space<vmem>>, %arg3: memref<1x8x128xf32, #tpu.memory_space<vmem>>) attributes {dimension_semantics = [#tpu.dimension_semantics<parallel>], iteration_bounds = array<i64: 1>, scalar_prefetch = 0 : i64, scratch_operands = 0 : i64, tpu.core_type = #tpu.core_type<tc>, window_params = [{transform_indices = @transform_0, window_bounds = array<i64: 16, 128>}, {transform_indices = @transform_1, window_bounds = array<i64: 16, 128>}, {transform_indices = @transform_2, window_bounds = array<i64: 1, 8, 128>}]} {
    %c0 = arith.constant 0 : index
    %c0_0 = arith.constant 0 : index
    %0 = vector.load %arg1[%c0, %c0_0] : memref<16x128xf32, #tpu.memory_space<vmem>>, vector<16x128xf32>
    %c0_1 = arith.constant 0 : index
    %c0_2 = arith.constant 0 : index
    %1 = vector.load %arg2[%c0_1, %c0_2] : memref<16x128xbf16, #tpu.memory_space<vmem>>, vector<16x128xbf16>
    %2 = arith.extf %1 : vector<16x128xbf16> to vector<16x128xf32>
    %cst = arith.constant 5.000000e-01 : f32
    %3 = vector.broadcast %cst : f32 to vector<16x128xf32>
    %4 = arith.cmpf ogt, %2, %3 : vector<16x128xf32>
    %cst_3 = arith.constant 1.000000e+00 : f32
    %5 = vector.broadcast %cst_3 : f32 to vector<16x128xf32>
    %6 = arith.subf %5, %0 : vector<16x128xf32>
    %7 = arith.select %4, %0, %6 : vector<16x128xi1>, vector<16x128xf32>
    %8 = math.log %7 : vector<16x128xf32>
    %cst_4 = arith.constant 0.000000e+00 : f32
    %9 = vector.broadcast %cst_4 : f32 to vector<16x128xf32>
    %10 = arith.subf %9, %8 : vector<16x128xf32>
    %cst_5 = arith.constant 1.000000e+02 : f32
    %11 = vector.broadcast %cst_5 : f32 to vector<16x128xf32>
    %12 = arith.minimumf %10, %11 : vector<16x128xf32>
    %cst_6 = arith.constant 1.000000e+00 : f32
    %13 = vector.broadcast %cst_6 : f32 to vector<16x128xf32>
    %14 = arith.subf %13, %7 : vector<16x128xf32>
    %15 = arith.mulf %14, %14 : vector<16x128xf32>
    %cst_7 = arith.constant 2.500000e-01 : f32
    %16 = vector.broadcast %cst_7 : f32 to vector<16x128xf32>
    %17 = arith.mulf %16, %15 : vector<16x128xf32>
    %18 = arith.mulf %17, %12 : vector<16x128xf32>
    %19 = vector.shape_cast %18 : vector<16x128xf32> to vector<2x8x128xf32>
    %cst_8 = arith.constant dense<0.000000e+00> : vector<8x128xf32>
    %20 = vector.multi_reduction <add>, %19, %cst_8 [0] : vector<2x8x128xf32> to vector<8x128xf32>
    %21 = vector.shape_cast %20 : vector<8x128xf32> to vector<1x8x128xf32>
    %c0_9 = arith.constant 0 : index
    %c0_10 = arith.constant 0 : index
    %c0_11 = arith.constant 0 : index
    %22 = vector.load %arg3[%c0_9, %c0_10, %c0_11] : memref<1x8x128xf32, #tpu.memory_space<vmem>>, vector<1x8x128xf32>
    tpu.vector_store %arg3[%c0_9, %c0_10, %c0_11], %21 {strides = array<i32>} : memref<1x8x128xf32, #tpu.memory_space<vmem>>, vector<1x8x128xf32>,
    return
  }
  func.func @transform_0(%arg0: i32) -> (i32, i32) {
    %c0_i32 = arith.constant 0 : i32
    %c0_i32_0 = arith.constant 0 : i32
    return %arg0, %c0_i32 : i32, i32
  }
  func.func @transform_1(%arg0: i32) -> (i32, i32) {
    %c0_i32 = arith.constant 0 : i32
    %c0_i32_0 = arith.constant 0 : i32
    return %arg0, %c0_i32 : i32, i32
  }
  func.func @transform_2(%arg0: i32) -> (i32, i32, i32) {
    %c0_i32 = arith.constant 0 : i32
    %c0_i32_0 = arith.constant 0 : i32
    %c0_i32_1 = arith.constant 0 : i32
    return %arg0, %c0_i32, %c0_i32_0 : i32, i32, i32
  }
}

</mosaic_0001>

<bundles_post_ra>
// kernel: tpu_custom_call.1
= control target key start
LH: loop header
LB: loop body
LE: loop exit
PB: predicated region body
PF: predicated region fallthrough
CT: control target
= control target key end

     0   :  { %7 = vsyncpa [#allocation3], 0  ;;  %s231_s0 = inlined_call_operand.hbm [shape: f32[16,128], index: 0, kind: input, shape index: {}]   ;;  %s232_s1 = inlined_call_operand.hbm [shape: bf16[16,128], index: 1, kind: input, shape index: {}]   ;;  %s233_s2 = inlined_call_operand.hbm [shape: f32[1,8,128], index: 2, kind: output, shape index: {}]  }
   0x1   :  { %8 = vsyncpa [#allocation6], 0 }
   0x2   :  { %9 = vsyncpa [#allocation4], 0  ;;  %s173_s9 = smov [#allocation2]   ;;  %s101_s13 = scalar_lea.hbm %s231_s0, 256 }
   0x3   :  { %s15_s10 = sshll.u32 %s173_s9, 4  ;;  %p102_p0 = scmp.ne.s32.totalorder %s231_s0, %s101_s13  ;;  %s16_s10 = int_to_ptr.vmem [resolvable:$true] %s15_s10 }
   0x4   :  { %p105_p1 = scmp.lt.u32.totalorder %s101_s13, %s231_s0 }
   0x6   :  { %p107_p2 = pnand %p105_p1, %p102_p0 }
   0x8   :  { %110 = shalt.err (!%p107_p2)
}
   0x9   :  { %s111_s18 = scalar_lea.vmem %s16_s10, 256  ;;  %p116_p4 = scmp.lt.s32.totalorder %s16_s10, %s16_s10 }
   0xa   :  { %p112_p3 = scmp.ne.s32.totalorder %s16_s10, %s111_s18  ;;  %p117_p5 = scmp.lt.s32.totalorder %s111_s18, %s111_s18 }
   0xc   :  { %p118_p6 = por %p117_p5, %p116_p4 }
   0xe   :  { %p119_p7 = pnand %p118_p6, %p112_p3 }
  0x10   :  { %122 = shalt.err (!%p119_p7)
}
  0x11   :  { %s174_s19 = smov 128   ;;  %s175_s20 = smov 8  }
  0x12   :  { %21 = dma.hbm_to_vmem [thread:$0]  %s231_s0, 256, %s16_s10, [#allocation3], %s174_s19, %s174_s19, %s175_s20  }
  0x13   :  { %s176_s23 = smov [#allocation5]   ;;  %s123_s27 = scalar_lea.hbm %s232_s1, 128 }
  0x14   :  { %s27_s24 = sshll.u32 %s176_s23, 4  ;;  %p124_p8 = scmp.ne.s32.totalorder %s232_s1, %s123_s27  ;;  %s28_s24 = int_to_ptr.vmem [resolvable:$true] %s27_s24 }
  0x15   :  { %p127_p9 = scmp.lt.u32.totalorder %s123_s27, %s232_s1 }
  0x17   :  { %p129_p10 = pnand %p127_p9, %p124_p8 }
  0x19   :  { %132 = shalt.err (!%p129_p10)
}
  0x1a   :  { %s133_s4 = scalar_lea.vmem %s28_s24, 128  ;;  %p138_p12 = scmp.lt.s32.totalorder %s28_s24, %s28_s24 }
  0x1b   :  { %p134_p11 = scmp.ne.s32.totalorder %s28_s24, %s133_s4  ;;  %p139_p13 = scmp.lt.s32.totalorder %s133_s4, %s133_s4 }
  0x1d   :  { %p140_p0 = por %p139_p13, %p138_p12 }
  0x1f   :  { %p141_p1 = pnand %p140_p0, %p134_p11 }
  0x21   :  { %144 = shalt.err (!%p141_p1)
}
  0x22   :  { %s177_s0 = smov 64   ;;  %s178_s5 = smov 4  }
  0x23   :  { %33 = dma.hbm_to_vmem [thread:$0]  %s232_s1, 128, %s28_s24, [#allocation6], %s177_s0, %s177_s0, %s178_s5  }
  0x24   :  { %167 = dma.done.wait [#allocation3], 256  }
  0x25   :  { %168 = vsyncadd [#allocation3], 4294967040 }
  0x26   :  { %169 = dma.done.wait [#allocation6], 128  }
  0x27   :  { %170 = vsyncadd [#allocation6], 4294967168  ;;  %v40_v0 = vld [vmem:[#allocation2] sm:$0xff]  ;;  %v41_v1 = vld [vmem:[#allocation2 + $0x8] sm:$0xff]  ;;  %s179_s1 = smov [#allocation7]  }
  0x28   :  { %v87_v2 = vld [vmem:[#allocation5] sm:$0xff]   ;;  %v48_v5 = vsub.f32 1.0, %v40_v0  ;;  %v49_v6 = vsub.f32 1.0, %v41_v1  ;;  %s76_s8 = sshll.u32 %s179_s1, 4  ;;  %s77_s8 = int_to_ptr.vmem [resolvable:$true] %s76_s8 }
  0x29   :  { %v88_v3 = vunpack.c.l.bf16 %v87_v2  ;;  %v89_v4 = vunpack.c.h.bf16 %v87_v2  ;;  %s145_s9 = scalar_lea.vmem %s77_s8, 128  ;;  %p150_p3 = scmp.lt.s32.totalorder %s77_s8, %s77_s8 }
  0x2a   :  { %p146_p2 = scmp.ne.s32.totalorder %s77_s8, %s145_s9  ;;  %p151_p4 = scmp.lt.s32.totalorder %s145_s9, %s145_s9 }
  0x2b   :  { %vm46_vm0 = vcmp.gt.f32.partialorder %v88_v3, 0.5  ;;  %vm47_vm1 = vcmp.gt.f32.partialorder %v89_v4, 0.5 }
  0x2c   :  { %v50_v7 = vsel %vm46_vm0, %v40_v0, %v48_v5  ;;  %v51_v8 = vsel %vm47_vm1, %v41_v1, %v49_v6  ;;  %p152_p5 = por %p151_p4, %p150_p3 }
  0x2d   :  { %97 = vlog2.f32 %v50_v7  ;;  %v60_v9 = vsub.f32 1.0, %v50_v7  ;;  %v61_v10 = vsub.f32 1.0, %v51_v8 }
  0x2e   :  { %99 = vlog2.f32 %v51_v8  ;;  %p153_p6 = pnand %p152_p5, %p146_p2 }
  0x2f   :  { %v62_v11 = vmul.f32 %v60_v9, %v60_v9  ;;  %v63_v13 = vmul.f32 %v61_v10, %v61_v10 }
  0x31   :  { %v64_v18 = vmul.f32 0.25, %v62_v11  ;;  %v65_v20 = vmul.f32 0.25, %v63_v13 }
  0x37   :  { %v98_v12 = vpop.eup %97 }
  0x38   :  { %v100_v14 = vpop.eup %99  ;;  %v53_v15 = vmul.f32 0.6931472, %v98_v12 }
  0x39   :  { %v55_v16 = vmul.f32 0.6931472, %v100_v14 }
  0x3a   :  { %v56_v17 = vsub.f32 0.0, %v53_v15 }
  0x3b   :  { %v57_v19 = vsub.f32 0.0, %v55_v16 }
  0x3c   :  { %v58_v21 = vmin.f32 %v56_v17, 100.0 }
  0x3d   :  { %v59_v22 = vmin.f32 %v57_v19, 100.0 }
  0x3e   :  { %v66_v23 = vmul.f32 %v64_v18, %v58_v21 }
  0x3f   :  { %v67_v24 = vmul.f32 %v65_v20, %v59_v22 }
  0x41   :  { %v68_v25 = vadd.f32 %v67_v24, %v66_v23 }
  0x43   :  { %69 = vst [vmem:[#allocation7] sm:$0xff] %v68_v25 }
  0x44   :  { %156 = shalt.err (!%p153_p6)
}
  0x45   :  { %s157_s12 = scalar_lea.hbm %s233_s2, 128 }
  0x46   :  { %p158_p7 = scmp.ne.s32.totalorder %s233_s2, %s157_s12  ;;  %p161_p8 = scmp.lt.u32.totalorder %s157_s12, %s233_s2 }
  0x48   :  { %p163_p9 = pnand %p161_p8, %p158_p7 }
  0x4a   :  { %166 = shalt.err (!%p163_p9)
}
  0x4b   :  { %79 = dma.vmem_to_hbm [thread:$0]  %s77_s8, 128, %s233_s2, [#allocation4]  }
  0x4c   :  { %171 = dma.done.wait [#allocation4], 128  }
  0x4d   :  { %172 = vsyncadd [#allocation4], 4294967168 }
  0x4e   :  { %83 = vsyncpa [#allocation3], 1 }
  0x4f   :  { %84 = vsyncpa [#allocation6], 1 }
  0x50   :  { %85 = vsyncpa [#allocation4], 1 }

</bundles_post_ra>
